<compile_context>
chip_gen: v7x
topology: tpu7x:2x2x1
jax: 0.10.0
libtpu: 0.0.40
codegen_flags: <defaults>
</compile_context>

<pallas_src>
import jax
import jax.numpy as jnp
from jax.experimental import pallas as pl
from jax.experimental.pallas import tpu as pltpu


def policy_kernel(x_ref, w1_ref, b1_ref, w2_ref, b2_ref, o_ref):
    # --- Linear 1 + ReLU ---
    h = jnp.dot(x_ref[...], w1_ref[...], preferred_element_type=jnp.float32)
    h = jnp.maximum(h + b1_ref[...], 0.0)          # broadcast [1, H] over [B, H]

    # --- Linear 2 ---
    logits = jnp.dot(h, w2_ref[...], preferred_element_type=jnp.float32)
    logits = logits + b2_ref[...]                  # broadcast [1, O] over [B, O]

    # --- Softmax(dim=-1), numerically stable ---
    m = jnp.max(logits, axis=-1, keepdims=True)
    e = jnp.exp(logits - m)
    denom = jnp.sum(e, axis=-1, keepdims=True)
    # approx reciprocal goes to the EUP slot (off the VALU); ~1e-3 rel. error.
    o_ref[...] = (e * pl.reciprocal(denom, approx=True)).astype(o_ref.dtype)


def policy_forward(x, w1, b1, w2, b2, *, block_b=256):
    """x: [B, I]; w1: [I, H]; b1: [1, H]; w2: [H, O]; b2: [1, O] -> [B, O]."""
    B, I = x.shape
    H = w1.shape[1]
    O = w2.shape[1]

    # Pad batch to a multiple of 8 (sublanes) so vregs / MXU rows are full.
    SUBLANE = 8
    Bp = max(SUBLANE, ((B + SUBLANE - 1) // SUBLANE) * SUBLANE)
    if Bp != B:
        x = jnp.pad(x, ((0, Bp - B), (0, 0)))

    if Bp <= block_b:
        # Small problem: everything fits in VMEM. Plain pallas_call, no grid,
        # no pipeline prologue/epilogue or per-step setup overhead.
        out = pl.pallas_call(
            policy_kernel,
            out_shape=jax.ShapeDtypeStruct((Bp, O), jnp.float32),
            in_specs=[pl.BlockSpec(memory_space=pltpu.MemorySpace.VMEM)] * 5,
            out_specs=pl.BlockSpec(memory_space=pltpu.MemorySpace.VMEM),
        )(x, w1, b1, w2, b2)
    else:
        # Large batch: tile B over a "parallel" grid axis. Weights/biases are
        # replicated (same block at every grid point).
        if Bp % block_b != 0:
            pad = block_b - (Bp % block_b)
            x = jnp.pad(x, ((0, pad), (0, 0)))
            Bp += pad
        out = pl.pallas_call(
            policy_kernel,
            out_shape=jax.ShapeDtypeStruct((Bp, O), jnp.float32),
            grid=(Bp // block_b,),
            in_specs=[
                pl.BlockSpec((block_b, I), lambda i: (i, 0)),
                pl.BlockSpec((I, H), lambda i: (0, 0)),
                pl.BlockSpec((1, H), lambda i: (0, 0)),
                pl.BlockSpec((H, O), lambda i: (0, 0)),
                pl.BlockSpec((1, O), lambda i: (0, 0)),
            ],
            out_specs=pl.BlockSpec((block_b, O), lambda i: (i, 0)),
            compiler_params=pltpu.CompilerParams(
                dimension_semantics=("parallel",),
                vmem_limit_bytes=48 * 1024 * 1024,  # safe under v7x 64 MiB VMEM
            ),
        )(x, w1, b1, w2, b2)

    return out[:B]


def init_policy_params(key, n_input, n_hidden, n_output):
    """Deterministic init mimicking nn.Linear default (U[-1/sqrt(fan_in), +])."""
    k1, k2, k3, k4 = jax.random.split(key, 4)
    bound1 = 1.0 / jnp.sqrt(jnp.float32(n_input))
    bound2 = 1.0 / jnp.sqrt(jnp.float32(n_hidden))
    # Stored as [in, out] (transpose of PyTorch's [out, in]).
    w1 = jax.random.uniform(k1, (n_input, n_hidden), jnp.float32, -bound1, bound1)
    b1 = jax.random.uniform(k2, (1, n_hidden), jnp.float32, -bound1, bound1)
    w2 = jax.random.uniform(k3, (n_hidden, n_output), jnp.float32, -bound2, bound2)
    b2 = jax.random.uniform(k4, (1, n_output), jnp.float32, -bound2, bound2)
    return w1, b1, w2, b2


def _reference(x, w1, b1, w2, b2):
    h = jnp.maximum(x @ w1 + b1, 0.0)
    return jax.nn.softmax(h @ w2 + b2, axis=-1)


if __name__ == "__main__":
    # Shapes consistent with the module: Policy(input=16, output=8, hidden=32),
    # evaluated on a small batch of environment states.
    B, I, H, O = 32, 16, 32, 8

    key = jax.random.PRNGKey(0)
    kx, kp, kx2 = jax.random.split(key, 3)
    x = jax.random.normal(kx, (B, I), jnp.float32)
    w1, b1, w2, b2 = init_policy_params(kp, I, H, O)

    # --- small-batch path (no grid) ---
    out = policy_forward(x, w1, b1, w2, b2)
    out = jax.block_until_ready(out)
    ref = _reference(x, w1, b1, w2, b2)
    assert out.shape == (B, O)
    # approx=True reciprocal => ~1e-3 relative error in the normalization.
    assert jnp.allclose(out, ref, atol=1e-2, rtol=1e-2)
    assert jnp.allclose(jnp.sum(out, axis=-1), 1.0, atol=1e-2)

    # --- large-batch path (B tiled over a "parallel" grid axis) ---
    B2 = 600  # not a multiple of the block; exercises padding + grid tiling
    x2 = jax.random.normal(kx2, (B2, I), jnp.float32)
    out2 = policy_forward(x2, w1, b1, w2, b2, block_b=256)
    out2 = jax.block_until_ready(out2)
    ref2 = _reference(x2, w1, b1, w2, b2)
    assert out2.shape == (B2, O)
    assert jnp.allclose(out2, ref2, atol=1e-2, rtol=1e-2)
    assert jnp.allclose(jnp.sum(out2, axis=-1), 1.0, atol=1e-2)

    print("KERNEL_OK")
</pallas_src>

<mosaic_0001>
module attributes {stable_mosaic.version = 11 : i64} {
  func.func @policy_kernel(%arg0: memref<32x16xf32, #tpu.memory_space<vmem>>, %arg1: memref<16x32xf32, #tpu.memory_space<vmem>>, %arg2: memref<1x32xf32, #tpu.memory_space<vmem>>, %arg3: memref<32x8xf32, #tpu.memory_space<vmem>>, %arg4: memref<1x8xf32, #tpu.memory_space<vmem>>, %arg5: memref<32x8xf32, #tpu.memory_space<vmem>>) attributes {dimension_semantics = [], scalar_prefetch = 0 : i64, scratch_operands = 0 : i64, tpu.core_type = #tpu.core_type<tc>} {
    %c0 = arith.constant 0 : index
    %c0_0 = arith.constant 0 : index
    %0 = vector.load %arg0[%c0, %c0_0] : memref<32x16xf32, #tpu.memory_space<vmem>>, vector<32x16xf32>
    %c0_1 = arith.constant 0 : index
    %c0_2 = arith.constant 0 : index
    %1 = vector.load %arg1[%c0_1, %c0_2] : memref<16x32xf32, #tpu.memory_space<vmem>>, vector<16x32xf32>
    %cst = arith.constant dense<0.000000e+00> : vector<32x32xf32>
    %2 = tpu.matmul %0, %1, %cst {dimension_numbers = #tpu.dot_dimension_numbers<[1], [0], [0], [1], [0, 0, 1, 1], [], []>} : vector<32x16xf32>, vector<16x32xf32>, vector<32x32xf32> -> vector<32x32xf32>
    %c0_3 = arith.constant 0 : index
    %c0_4 = arith.constant 0 : index
    %3 = vector.load %arg2[%c0_3, %c0_4] : memref<1x32xf32, #tpu.memory_space<vmem>>, vector<1x32xf32>
    %4 = vector.broadcast %3 : vector<1x32xf32> to vector<32x32xf32>
    %5 = arith.addf %2, %4 : vector<32x32xf32>
    %cst_5 = arith.constant 0.000000e+00 : f32
    %6 = vector.broadcast %cst_5 : f32 to vector<32x32xf32>
    %7 = arith.maximumf %5, %6 : vector<32x32xf32>
    %c0_6 = arith.constant 0 : index
    %c0_7 = arith.constant 0 : index
    %8 = vector.load %arg3[%c0_6, %c0_7] : memref<32x8xf32, #tpu.memory_space<vmem>>, vector<32x8xf32>
    %cst_8 = arith.constant dense<0.000000e+00> : vector<32x8xf32>
    %9 = tpu.matmul %7, %8, %cst_8 {dimension_numbers = #tpu.dot_dimension_numbers<[1], [0], [0], [1], [0, 0, 1, 1], [], []>} : vector<32x32xf32>, vector<32x8xf32>, vector<32x8xf32> -> vector<32x8xf32>
    %c0_9 = arith.constant 0 : index
    %c0_10 = arith.constant 0 : index
    %10 = vector.load %arg4[%c0_9, %c0_10] : memref<1x8xf32, #tpu.memory_space<vmem>>, vector<1x8xf32>
    %11 = vector.broadcast %10 : vector<1x8xf32> to vector<32x8xf32>
    %12 = arith.addf %9, %11 : vector<32x8xf32>
    %cst_11 = arith.constant dense<0xFF800000> : vector<32xf32>
    %13 = vector.multi_reduction <maximumf>, %12, %cst_11 [1] : vector<32x8xf32> to vector<32xf32>
    %14 = vector.shape_cast %13 : vector<32xf32> to vector<32x1xf32>
    %15 = vector.broadcast %14 : vector<32x1xf32> to vector<32x8xf32>
    %16 = arith.subf %12, %15 : vector<32x8xf32>
    %17 = math.exp %16 : vector<32x8xf32>
    %cst_12 = arith.constant dense<0.000000e+00> : vector<32xf32>
    %18 = vector.multi_reduction <add>, %17, %cst_12 [1] : vector<32x8xf32> to vector<32xf32>
    %19 = vector.shape_cast %18 : vector<32xf32> to vector<32x1xf32>
    %20 = tpu.reciprocal %19 {approx = true} : vector<32x1xf32> -> vector<32x1xf32>
    %21 = vector.broadcast %20 : vector<32x1xf32> to vector<32x8xf32>
    %22 = arith.mulf %17, %21 : vector<32x8xf32>
    %c0_13 = arith.constant 0 : index
    %c0_14 = arith.constant 0 : index
    %23 = vector.load %arg5[%c0_13, %c0_14] : memref<32x8xf32, #tpu.memory_space<vmem>>, vector<32x8xf32>
    tpu.vector_store %arg5[%c0_13, %c0_14], %22 {strides = array<i32>} : memref<32x8xf32, #tpu.memory_space<vmem>>, vector<32x8xf32>,
    return
  }
}

</mosaic_0001>

<bundles_post_ra>
// kernel: tpu_custom_call.1
= control target key start
LH: loop header
LB: loop body
LE: loop exit
PB: predicated region body
PF: predicated region fallthrough
CT: control target
= control target key end

     0   :  { %vm33_vm0 = vcmask 130048   ;;  %vm146_vm1 = vcmask 261120   ;;  %vm244_vm2 = vcmask 64512   ;;  %s467_s1 = inlined_call_operand.vmem [shape: f32[16,32], index: 1, kind: input, shape index: {}]   ;;  %s468_s0 = inlined_call_operand.vmem [shape: f32[32,16], index: 0, kind: input, shape index: {}]   ;;  %s469_s3 = inlined_call_operand.vmem [shape: f32[32,8], index: 3, kind: input, shape index: {}]   ;;  %s470_s2 = inlined_call_operand.vmem [shape: f32[1,32], index: 2, kind: input, shape index: {}]   ;;  %s471_s4 = inlined_call_operand.vmem [shape: f32[1,8], index: 4, kind: input, shape index: {}]   ;;  %s472_s5 = inlined_call_operand.vmem [shape: f32[32,8], index: 5, kind: output, shape index: {}]  }
   0x1   :  { %v24_v0 = vld [vmem:[%s467_s1] sm:$0xff]  ;;  %v25_v1 = vld [vmem:[%s467_s1 + $0x8] sm:$0xff]  ;;  %v22_v8 = vld [vmem:[%s468_s0 + $0x10] sm:$0xff] }
   0x2   :  { %v20_v2 = vld [vmem:[%s468_s0] sm:$0xff]  ;;  %v345_v3 = vpack.c.bf16 %v25_v1, %v24_v0  ;;  %v136_v5 = vld [vmem:[%s469_s3 + $0x8] sm:$0xff]  ;;  %v23_v9 = vld [vmem:[%s468_s0 + $0x18] sm:$0xff] }
   0x3   :  { %325 = vmatprep.mubr.msk.f32.mxu0 %vm33_vm0, %v20_v2  ;;  %v135_v4 = vld [vmem:[%s469_s3] sm:$0xff]  ;;  %v21_v7 = vld [vmem:[%s468_s0 + $0x8] sm:$0xff]  ;;  %v137_v10 = vld [vmem:[%s469_s3 + $0x10] sm:$0xff] }
   0x4   :  { %346 = vmatprep.subr.bf16.mxu0 %v345_v3  ;;  %v349_v6 = vpack.c.bf16 %v136_v5, %v135_v4  ;;  %v138_v11 = vld [vmem:[%s469_s3 + $0x18] sm:$0xff]  ;;  %v297_v13 = vld [vmem:[%s470_s2] ss:$0 sm:$0xff] }
   0x5   :  { %348 = vmatpush3.bf16.msra.mxu0 %v345_v3  ;;  %v353_v12 = vpack.c.bf16 %v138_v11, %v137_v10  ;;  %v302_v26 = vld [vmem:[%s471_s4] ss:$0 sm:$0xff] }
   0x6   :  { %350 = vmatprep.subr.bf16.mxu1 %v349_v6 }
   0x7   :  { %352 = vmatpush3.bf16.msra.mxu1 %v349_v6 }
   0x8   :  { %326 = vmatmul.mubr.msk.f32.vlgmr.msra.gmra.mrb[0].mxu0 %vm33_vm0, %v21_v7  ;;  %354 = vmatprep.subr.bf16.mxu1 %v353_v12 }
   0x9   :  { %328 = vmatprep.mubr.msk.f32.mxu0 %vm33_vm0, %v22_v8 }
   0xb   :  { %356 = vmatpush3.bf16.msra.mxu1 %v353_v12 }
   0xc   :  { %329 = vmatmul.mubr.msk.f32.gmra.mrb[2].mxu0 %vm33_vm0, %v23_v9 }
  0xdb   :  { %v327_v14 = vpop.f32.mrb[0].mxu0 }
  0xdc   :  { %v118_v15 = vadd.f32 %v327_v14, %v297_v13  ;;  %v112_v16 = vpop.f32.mrb[1].mxu0 }
  0xdd   :  { %v113_v17 = vadd.f32 %v297_v13, %v112_v16 }
  0xde   :  { %v132_v20 = vmax.f32 %v118_v15, 0.0 }
  0xdf   :  { %v131_v18 = vmax.f32 %v113_v17, 0.0  ;;  %v330_v19 = vpop.f32.mrb[2].mxu0 }
  0xe0   :  { %v128_v21 = vadd.f32 %v330_v19, %v297_v13  ;;  %v122_v22 = vpop.f32.mrb[3].mxu0 }
  0xe1   :  { %v123_v23 = vadd.f32 %v297_v13, %v122_v22  ;;  %339 = vmatprep.mubr.msk.f32.mxu1 %vm146_vm1, %v131_v18 }
  0xe2   :  { %340 = vmatmul.mubr.msk.f32.vlgmr.msra.gmra.mrb[0].mxu1 %vm146_vm1, %v132_v20  ;;  %v134_v25 = vmax.f32 %v128_v21, 0.0 }
  0xe3   :  { %v133_v24 = vmax.f32 %v123_v23, 0.0 }
  0xe5   :  { %342 = vmatprep.mubr.msk.f32.mxu1 %vm146_vm1, %v133_v24 }
  0xe6   :  { %343 = vmatmul.mubr.msk.f32.gmra.mrb[2].mxu1 %vm146_vm1, %v134_v25 }
 0x1b5   :  { %v341_v27 = vpop.f32.mrb[0].mxu1 }
 0x1b6   :  { %v225_v28 = vpop.f32.mrb[1].mxu1  ;;  %v231_v30 = vadd.f32 %v341_v27, %v302_v26 }
 0x1b7   :  { %v226_v29 = vadd.f32 %v302_v26, %v225_v28 }
 0x1b8   :  { %v248_v37 = vsel %vm244_vm2, %v231_v30, -inf }
 0x1b9   :  { %v344_v31 = vpop.f32.mrb[2].mxu1  ;;  %v245_v32 = vsel %vm244_vm2, %v226_v29, -inf }
 0x1ba   :  { %v235_v33 = vpop.f32.mrb[3].mxu1  ;;  %246 = vmax.xlane.f32.xlu0 %v245_v32  ;;  %v241_v35 = vadd.f32 %v344_v31, %v302_v26 }
 0x1bb   :  { %v236_v34 = vadd.f32 %v302_v26, %v235_v33 }
 0x1bc   :  { %v254_v38 = vsel %vm244_vm2, %v241_v35, -inf }
 0x1bd   :  { %v251_v36 = vsel %vm244_vm2, %v236_v34, -inf }
 0x1be   :  { %252 = vmax.xlane.f32.xlu1 %v251_v36  ;;  %249 = vmax.xlane.f32.xlu0 %v248_v37 }
 0x1c2   :  { %255 = vmax.xlane.f32.xlu1 %v254_v38 }
 0x247   :  { %v247_v39 = vpop.xlane.xlu0 %246 }
 0x248   :  { %v257_v40 = vsub.f32 %v226_v29, %v247_v39 }
 0x24a   :  { %v261_v41 = vmul.f32 1.442695, %v257_v40 }
 0x24b   :  { %v253_v42 = vpop.xlane.xlu1 %252  ;;  %v250_v43 = vpop.xlane.xlu0 %249 }
 0x24c   :  { %357 = vpow2.f32 %v261_v41  ;;  %v259_v44 = vsub.f32 %v236_v34, %v253_v42  ;;  %v258_v45 = vsub.f32 %v231_v30, %v250_v43 }
 0x24e   :  { %v265_v46 = vmul.f32 1.442695, %v259_v44  ;;  %v263_v47 = vmul.f32 1.442695, %v258_v45 }
 0x24f   :  { %v256_v48 = vpop.xlane.xlu1 %255 }
 0x250   :  { %359 = vpow2.f32 %v265_v46  ;;  %v260_v49 = vsub.f32 %v241_v35, %v256_v48 }
 0x251   :  { %361 = vpow2.f32 %v263_v47 }
 0x252   :  { %v267_v50 = vmul.f32 1.442695, %v260_v49 }
 0x254   :  { %363 = vpow2.f32 %v267_v50 }
 0x256   :  { %v358_v51 = vpop.eup %357 }
 0x257   :  { %v269_v52 = vsel %vm244_vm2, %v358_v51, 0.0 }
 0x258   :  { %270 = vadd.xlane.f32.xlu0 %v269_v52 }
 0x25a   :  { %v360_v53 = vpop.eup %359 }
 0x25b   :  { %v362_v54 = vpop.eup %361  ;;  %v275_v55 = vsel %vm244_vm2, %v360_v53, 0.0 }
 0x25c   :  { %276 = vadd.xlane.f32.xlu0 %v275_v55  ;;  %v272_v56 = vsel %vm244_vm2, %v362_v54, 0.0 }
 0x25d   :  { %273 = vadd.xlane.f32.xlu1 %v272_v56 }
 0x25e   :  { %v364_v57 = vpop.eup %363 }
 0x25f   :  { %v278_v58 = vsel %vm244_vm2, %v364_v57, 0.0 }
 0x261   :  { %279 = vadd.xlane.f32.xlu1 %v278_v58 }
 0x2e5   :  { %v271_v59 = vpop.xlane.xlu0 %270 }
 0x2e6   :  { %365 = vrcp.f32 %v271_v59 }
 0x2e9   :  { %v277_v60 = vpop.xlane.xlu0 %276 }
 0x2ea   :  { %v274_v61 = vpop.xlane.xlu1 %273  ;;  %367 = vrcp.f32 %v277_v60 }
 0x2eb   :  { %369 = vrcp.f32 %v274_v61 }
 0x2ee   :  { %v280_v62 = vpop.xlane.xlu1 %279 }
 0x2ef   :  { %371 = vrcp.f32 %v280_v62 }
 0x2f0   :  { %v366_v63 = vpop.eup %365 }
 0x2f1   :  { %v285_v0 = vmul.f32 %v366_v63, %v358_v51 }
 0x2f3   :  { %289 = vst.msk [vmem:[%s472_s5] sm:$0xff] %vm244_vm2, %v285_v0 }
 0x2f4   :  { %v368_v1 = vpop.eup %367 }
 0x2f5   :  { %v370_v2 = vpop.eup %369  ;;  %v287_v3 = vmul.f32 %v368_v1, %v360_v53 }
 0x2f6   :  { %v286_v4 = vmul.f32 %v370_v2, %v362_v54 }
 0x2f7   :  { %291 = vst.msk [vmem:[%s472_s5 + $0x10] sm:$0xff] %vm244_vm2, %v287_v3 }
 0x2f8   :  { %290 = vst.msk [vmem:[%s472_s5 + $0x8] sm:$0xff] %vm244_vm2, %v286_v4 }
 0x2f9   :  { %v372_v5 = vpop.eup %371 }
 0x2fa   :  { %v288_v6 = vmul.f32 %v372_v5, %v364_v57 }
 0x2fc   :  { %292 = vst.msk [vmem:[%s472_s5 + $0x18] sm:$0xff] %vm244_vm2, %v288_v6 }

</bundles_post_ra>
